<compile_context>
chip_gen: v7x
topology: tpu7x:2x2x1
jax: 0.10.0
libtpu: 0.0.40
codegen_flags: <defaults>
</compile_context>

<pallas_src>
import jax
import jax.numpy as jnp
from jax.experimental import pallas as pl
from jax.experimental.pallas import tpu as pltpu

LANES_MIN = 128                    # minimum lane width of a vreg
LANE_WIDTHS = (1024, 512, 256, 128)  # candidate lane-dense view widths
PER_BUFFER_BYTES = 8 * 1024 * 1024   # ~8 MiB per VMEM buffer (dtype-aware rows)
VMEM_LIMIT_BYTES = 48 * 1024 * 1024  # 4 buffers x 8 MiB = 32 MiB < 48 MiB
                                     # (safe under v7x's 64 MiB physical VMEM)


def _relu_kernel(x_ref, o_ref):
    x = x_ref[...]
    # Faithful to the spec's Triton kernel: tl.where(x >= 0, x, 0).
    # (NaN -> 0, -0.0 passes through; scalar zero splat -> single VPU select.)
    zero = jnp.zeros((), dtype=x.dtype)
    o_ref[...] = jnp.where(x >= 0, x, zero)


def _choose_lane_width(n: int) -> int:
    for w in LANE_WIDTHS:
        if n % w == 0:
            return w
    return LANES_MIN


def relu_pallas(x: jax.Array, *, donate: bool = False) -> jax.Array:
    """Elementwise ReLU (forward) via a Pallas TPU kernel.

    Matches the reference module's `tl.where(x >= 0, x, 0)` semantics for any
    shape/dtype.  `donate=True` aliases the output onto the input buffer to
    halve peak HBM footprint; it only takes effect on the (common) path where
    the element count is a multiple of 128, so the alias really targets the
    caller-visible buffer rather than a padded temporary.
    """
    orig_shape = x.shape
    dtype = x.dtype
    size = int(x.size)
    if size == 0:
        return x

    # View as (rows, W) with the widest lane-dense W available.  A reshape of
    # a contiguous buffer is free; only pad (rare) when size % 128 != 0.
    pad = (-size) % LANES_MIN
    x_flat = jnp.ravel(x)
    if pad:
        # TODO(synk): handle the <128-element tail in-kernel (masked ragged
        # last block on the unpadded flat view) to avoid the pad/slice copies.
        x_flat = jnp.pad(x_flat, (0, pad))
    padded = size + pad
    lane_w = _choose_lane_width(padded)
    rows = padded // lane_w
    x2d = x_flat.reshape(rows, lane_w)

    # Dtype-aware row tile from the per-buffer byte budget, rounded to a
    # multiple of 32 so bf16/int8/fp8 sublane packing stays dense.  For small
    # inputs the full extent is used (grid of 1).
    itemsize = jnp.dtype(dtype).itemsize
    budget_rows = max(32, (PER_BUFFER_BYTES // (lane_w * itemsize)) // 32 * 32)
    row_tile = min(budget_rows, rows)
    grid = (pl.cdiv(rows, row_tile),)   # ragged last block -> masked OOB r/w
                                        # (valid: op is purely elementwise)

    extra_kwargs = {}
    if donate and pad == 0:
        extra_kwargs["input_output_aliases"] = {0: 0}

    out2d = pl.pallas_call(
        _relu_kernel,
        out_shape=jax.ShapeDtypeStruct((rows, lane_w), dtype),
        grid_spec=pltpu.PrefetchScalarGridSpec(
            num_scalar_prefetch=0,
            grid=grid,
            in_specs=[pl.BlockSpec((row_tile, lane_w), lambda i: (i, 0))],
            out_specs=pl.BlockSpec((row_tile, lane_w), lambda i: (i, 0)),
        ),
        compiler_params=pltpu.CompilerParams(
            # Single parallel axis: on v7x the grid steps are sharded across
            # both TensorCores so both DMA engines drive HBM bandwidth.
            dimension_semantics=("parallel",),
            # 2 in-buffers + 2 out-buffers x 8 MiB = 32 MiB; raise the scoped
            # limit above the 16/32 MiB defaults, with headroom under v7x's
            # 64 MiB physical VMEM.
            vmem_limit_bytes=VMEM_LIMIT_BYTES,
        ),
        cost_estimate=pl.CostEstimate(
            flops=size,
            transcendentals=0,
            bytes_accessed=2 * size * itemsize,
        ),
        **extra_kwargs,
    )(x2d)

    out_flat = out2d.reshape(padded)
    if pad:
        out_flat = out_flat[:size]
    return out_flat.reshape(orig_shape)


# TODO(synk): backward pass (ReLUKernel.backward / autograd.Function) not
# implemented — only the forward pass of the module is required here.


if __name__ == "__main__":
    key = jax.random.PRNGKey(0)

    def ref(v):
        # Exact reference semantics of the Triton kernel: where(x >= 0, x, 0).
        return jnp.where(v >= 0, v, jnp.zeros((), dtype=v.dtype))

    # 1) Small NCHW-style input consistent with a typical conv-activation use
    #    (2048 elements -> lane-widened (2, 1024) view, single grid step).
    x = jax.random.normal(key, (2, 4, 16, 16), dtype=jnp.float32)
    y = jax.block_until_ready(relu_pallas(x))
    assert y.shape == x.shape and y.dtype == x.dtype
    assert jnp.array_equal(y, ref(x)), "Pallas ReLU mismatch (f32)"

    # 2) bf16 input (exercises dtype-aware tiling).
    xb = jax.random.normal(jax.random.PRNGKey(1), (2, 4, 16, 16),
                           dtype=jnp.bfloat16)
    yb = jax.block_until_ready(relu_pallas(xb))
    assert yb.dtype == jnp.bfloat16
    assert jnp.array_equal(yb, ref(xb)), "Pallas ReLU mismatch (bf16)"

    # 3) Ragged size (105 elements, not a multiple of 128) -> pad path.
    xr = jax.random.normal(jax.random.PRNGKey(2), (3, 5, 7), dtype=jnp.float32)
    yr = jax.block_until_ready(relu_pallas(xr))
    assert yr.shape == xr.shape
    assert jnp.array_equal(yr, ref(xr)), "Pallas ReLU mismatch (ragged)"

    print("KERNEL_OK")
</pallas_src>

<mosaic_0001>
module attributes {stable_mosaic.version = 11 : i64} {
  func.func @_relu_kernel(%arg0: i32, %arg1: memref<2x1024xf32, #tpu.memory_space<vmem>>, %arg2: memref<2x1024xf32, #tpu.memory_space<vmem>>) attributes {dimension_semantics = [#tpu.dimension_semantics<parallel>], iteration_bounds = array<i64: 1>, scalar_prefetch = 0 : i64, scratch_operands = 0 : i64, tpu.core_type = #tpu.core_type<tc>, window_params = [{transform_indices = @transform_0, window_bounds = array<i64: 2, 1024>}, {transform_indices = @transform_1, window_bounds = array<i64: 2, 1024>}]} {
    %c0 = arith.constant 0 : index
    %c0_0 = arith.constant 0 : index
    %0 = vector.load %arg1[%c0, %c0_0] : memref<2x1024xf32, #tpu.memory_space<vmem>>, vector<2x1024xf32>
    %cst = arith.constant 0.000000e+00 : f32
    %1 = vector.broadcast %cst : f32 to vector<2x1024xf32>
    %2 = arith.cmpf oge, %0, %1 : vector<2x1024xf32>
    %cst_1 = arith.constant 0.000000e+00 : f32
    %3 = vector.broadcast %cst_1 : f32 to vector<2x1024xf32>
    %4 = arith.select %2, %0, %3 : vector<2x1024xi1>, vector<2x1024xf32>
    %c0_2 = arith.constant 0 : index
    %c0_3 = arith.constant 0 : index
    %5 = vector.load %arg2[%c0_2, %c0_3] : memref<2x1024xf32, #tpu.memory_space<vmem>>, vector<2x1024xf32>
    tpu.vector_store %arg2[%c0_2, %c0_3], %4 {strides = array<i32>} : memref<2x1024xf32, #tpu.memory_space<vmem>>, vector<2x1024xf32>,
    return
  }
  func.func @transform_0(%arg0: i32) -> (i32, i32) {
    %c0_i32 = arith.constant 0 : i32
    %c0_i32_0 = arith.constant 0 : i32
    return %arg0, %c0_i32 : i32, i32
  }
  func.func @transform_1(%arg0: i32) -> (i32, i32) {
    %c0_i32 = arith.constant 0 : i32
    %c0_i32_0 = arith.constant 0 : i32
    return %arg0, %c0_i32 : i32, i32
  }
}

</mosaic_0001>

<bundles_post_ra>
// kernel: tpu_custom_call.1
= control target key start
LH: loop header
LB: loop body
LE: loop exit
PB: predicated region body
PF: predicated region fallthrough
CT: control target
= control target key end

     0   :  { %6 = vsyncpa [#allocation3], 0  ;;  %s130_s0 = inlined_call_operand.hbm [shape: f32[2,1024], index: 0, kind: input, shape index: {}]   ;;  %s131_s1 = inlined_call_operand.hbm [shape: f32[2,1024], index: 1, kind: output, shape index: {}]  }
   0x1   :  { %7 = vsyncpa [#allocation4], 0  ;;  %s94_s6 = smov [#allocation2]   ;;  %s46_s10 = scalar_lea.hbm %s130_s0, 256 }
   0x2   :  { %s14_s7 = sshll.u32 %s94_s6, 4  ;;  %p47_p0 = scmp.ne.s32.totalorder %s130_s0, %s46_s10  ;;  %s15_s7 = int_to_ptr.vmem [resolvable:$true] %s14_s7 }
   0x3   :  { %p50_p1 = scmp.lt.u32.totalorder %s46_s10, %s130_s0 }
   0x5   :  { %p52_p2 = pnand %p50_p1, %p47_p0 }
   0x7   :  { %55 = shalt.err (!%p52_p2)
}
   0x8   :  { %s56_s15 = scalar_lea.vmem %s15_s7, 256  ;;  %p61_p4 = scmp.lt.s32.totalorder %s15_s7, %s15_s7 }
   0x9   :  { %p57_p3 = scmp.ne.s32.totalorder %s15_s7, %s56_s15  ;;  %p62_p5 = scmp.lt.s32.totalorder %s56_s15, %s56_s15 }
   0xb   :  { %p63_p6 = por %p62_p5, %p61_p4 }
   0xd   :  { %p64_p7 = pnand %p63_p6, %p57_p3 }
   0xf   :  { %67 = shalt.err (!%p64_p7)
}
  0x10   :  { %17 = dma.hbm_to_vmem [thread:$0]  %s130_s0, 256, %s15_s7, [#allocation3]  }
  0x11   :  { %90 = dma.done.wait [#allocation3], 256  }
  0x12   :  { %91 = vsyncadd [#allocation3], 4294967040  ;;  %s95_s18 = smov [#allocation5]   ;;  %v21_v0 = vld [vmem:[#allocation2] sm:$0xff]  ;;  %v22_v1 = vld [vmem:[#allocation2 + $0x8] sm:$0xff] }
  0x13   :  { %s35_s19 = sshll.u32 %s95_s18, 4  ;;  %vm23_vm0 = vcmp.ge.f32.partialorder %v21_v0, 0.0  ;;  %vm24_vm1 = vcmp.ge.f32.partialorder %v22_v1, 0.0  ;;  %s36_s19 = int_to_ptr.vmem [resolvable:$true] %s35_s19 }
  0x14   :  { %v25_v2 = vsel %vm23_vm0, %v21_v0, 0.0  ;;  %v26_v3 = vsel %vm24_vm1, %v22_v1, 0.0  ;;  %s68_s20 = scalar_lea.vmem %s36_s19, 256  ;;  %p73_p9 = scmp.lt.s32.totalorder %s36_s19, %s36_s19 }
  0x15   :  { %27 = vst [vmem:[#allocation5] sm:$0xff] %v25_v2  ;;  %28 = vst [vmem:[#allocation5 + $0x8] sm:$0xff] %v26_v3  ;;  %p69_p8 = scmp.ne.s32.totalorder %s36_s19, %s68_s20  ;;  %p74_p10 = scmp.lt.s32.totalorder %s68_s20, %s68_s20 }
  0x17   :  { %p75_p11 = por %p74_p10, %p73_p9 }
  0x19   :  { %p76_p12 = pnand %p75_p11, %p69_p8 }
  0x1b   :  { %79 = shalt.err (!%p76_p12)
}
  0x1c   :  { %s80_s22 = scalar_lea.hbm %s131_s1, 256 }
  0x1d   :  { %p81_p13 = scmp.ne.s32.totalorder %s131_s1, %s80_s22  ;;  %p84_p0 = scmp.lt.u32.totalorder %s80_s22, %s131_s1 }
  0x1f   :  { %p86_p1 = pnand %p84_p0, %p81_p13 }
  0x21   :  { %89 = shalt.err (!%p86_p1)
}
  0x22   :  { %38 = dma.vmem_to_hbm [thread:$0]  %s36_s19, 256, %s131_s1, [#allocation4]  }
  0x23   :  { %92 = dma.done.wait [#allocation4], 256  }
  0x24   :  { %93 = vsyncadd [#allocation4], 4294967040 }
  0x25   :  { %42 = vsyncpa [#allocation3], 1 }
  0x26   :  { %43 = vsyncpa [#allocation4], 1 }

</bundles_post_ra>
